<compile_context>
chip_gen: v7x
topology: tpu7x:2x2x1
jax: 0.10.0
libtpu: 0.0.40
codegen_flags: <defaults>
</compile_context>

<pallas_src>
import numpy as np
import jax
import jax.numpy as jnp
from jax import lax
from jax.experimental import pallas as pl
from jax.experimental.pallas import tpu as pltpu


# ---------------------------------------------------------------------------
# Pallas kernel bodies
# ---------------------------------------------------------------------------
def _full_kernel(w_ref, jr_ref, jc_ref, out_ref):
    """out[g*Nr:(g+1)*Nr, :] += (J_row * W[g]) @ J_col_tile.T for all g.

    grid = (Nc_tiles, P // tk); axis 1 is the reduction over parameter chunks.
    The output block index is constant across k, so out_ref is VMEM-resident
    and doubles as the accumulator.
    """
    k = pl.program_id(1)

    @pl.when(k == 0)
    def _():
        out_ref[...] = jnp.zeros_like(out_ref)

    w = w_ref[...]                      # (G, tk)
    jr = jr_ref[...]                    # (Nr, tk)
    jc = jc_ref[...]                    # (tnc, tk)
    g_groups = w.shape[0]

    # Stack all groups along the MXU M dimension: (G * Nr, tk).
    # (static Python loop, unrolled at trace time; concat along sublanes)
    stacked = jnp.concatenate(
        [jr * w[g:g + 1, :] for g in range(g_groups)], axis=0)

    # (G*Nr, tk) x (tnc, tk) contracted on the last dim of both -> (G*Nr, tnc)
    out_ref[...] += lax.dot_general(
        stacked, jc,
        dimension_numbers=(((1,), (1,)), ((), ())),
        preferred_element_type=jnp.float32)


def _diag_kernel(w_ref, jr_ref, jc_ref, out_ref):
    """out[g, i] += sum_j W[g, j] * J_row[i, j] * J_col[i, j].

    Expressed as W_tile @ (J_row * J_col).T so the reduction runs on the MXU
    and the (G, tnr) output block is lane-dense (tnr along lanes).
    grid = (Nr_tiles, P // tk).
    """
    k = pl.program_id(1)

    @pl.when(k == 0)
    def _():
        out_ref[...] = jnp.zeros_like(out_ref)

    prod = jr_ref[...] * jc_ref[...]    # (tnr, tk)
    # (G, tk) x (tnr, tk) contracted on the last dim of both -> (G, tnr)
    out_ref[...] += lax.dot_general(
        w_ref[...], prod,
        dimension_numbers=(((1,), (1,)), ((), ())),
        preferred_element_type=jnp.float32)


# ---------------------------------------------------------------------------
# Host-side helpers
# ---------------------------------------------------------------------------
def build_group_weights(opt_slices_gen, non_opt_slices_gen, n_kernel_groups, P,
                        with_prior_prec=True):
    """Fold the slice generators into a dense (G, P) weight matrix."""
    W = np.zeros((n_kernel_groups, P), dtype=np.float32)
    for kernel_group, _, pslices in opt_slices_gen:
        for s in pslices:
            W[kernel_group, s] += 1.0
    for _, pvar, pslices in non_opt_slices_gen:
        for s in pslices:
            W[-1, s] += float(pvar) if with_prior_prec else 1.0
    return jnp.asarray(W)


def _pick_tile(total, target, quantum=128):
    """Largest multiple-of-`quantum` divisor of `total` that is <= target.

    Falls back to the full extent (single tile) if no such divisor exists,
    which always satisfies the (8, 128) BlockSpec constraint.
    """
    if total <= target:
        return total
    t = (min(target, total) // quantum) * quantum
    while t >= quantum:
        if total % t == 0:
            return t
        t -= quantum
    return total


def parallel_calc_kernel(J_row, J_col, W, calc_diag=False, tk=512, tn=512,
                         vmem_limit_bytes=48 * 1024 * 1024):
    """Pallas forward pass equivalent of Parallel_calc_kernel.forward."""
    G, P = W.shape
    Nr, Pr = J_row.shape
    Nc, Pc = J_col.shape
    assert P == Pr == Pc, "parameter dimension mismatch"

    J_row = J_row.astype(jnp.float32)
    J_col = J_col.astype(jnp.float32)
    W = W.astype(jnp.float32)

    tk = _pick_tile(P, tk)              # reduction (parameter) tile
    kt = P // tk

    cparams = pltpu.CompilerParams(
        dimension_semantics=("parallel", "arbitrary"),
        vmem_limit_bytes=vmem_limit_bytes)

    if not calc_diag:
        # N_col tiling keeps a parallel grid axis and bounds VMEM for large Nc.
        tnc = _pick_tile(Nc, tn)
        grid = (Nc // tnc, kt)

        out = pl.pallas_call(
            _full_kernel,
            out_shape=jax.ShapeDtypeStruct((G * Nr, Nc), jnp.float32),
            grid_spec=pltpu.PrefetchScalarGridSpec(
                num_scalar_prefetch=0,
                grid=grid,
                in_specs=[
                    pl.BlockSpec((G, tk), lambda j, k: (0, k)),     # W
                    pl.BlockSpec((Nr, tk), lambda j, k: (0, k)),    # J_row
                    pl.BlockSpec((tnc, tk), lambda j, k: (j, k)),   # J_col
                ],
                out_specs=pl.BlockSpec((G * Nr, tnc), lambda j, k: (0, j)),
            ),
            compiler_params=cparams,
        )(W, J_row, J_col)
        return out.reshape(G, Nr, Nc)

    # --- diagonal path ------------------------------------------------------
    assert Nr == Nc, "calc_diag requires J_row and J_col with equal leading dim"
    tnr = _pick_tile(Nr, tn)
    grid = (Nr // tnr, kt)

    out = pl.pallas_call(
        _diag_kernel,
        out_shape=jax.ShapeDtypeStruct((G, Nr), jnp.float32),
        grid_spec=pltpu.PrefetchScalarGridSpec(
            num_scalar_prefetch=0,
            grid=grid,
            in_specs=[
                pl.BlockSpec((G, tk), lambda i, k: (0, k)),      # W
                pl.BlockSpec((tnr, tk), lambda i, k: (i, k)),    # J_row
                pl.BlockSpec((tnr, tk), lambda i, k: (i, k)),    # J_col
            ],
            out_specs=pl.BlockSpec((G, tnr), lambda i, k: (0, i)),
        ),
        compiler_params=cparams,
    )(W, J_row, J_col)
    return out                                                    # (G, Nr)


# ---------------------------------------------------------------------------
# Example / self-test
# ---------------------------------------------------------------------------
if __name__ == "__main__":
    # Small, deterministic problem.
    N_ROW, N_COL, P, G = 16, 16, 2048, 3

    # Deterministic slice structure (the module's "parameters"):
    #   kernel groups 0 and 1 hold the optimized-parameter slices,
    #   the last group (index 2) collects the non-optimized slices with prior
    #   variances pvar.
    opt_slices_gen = [
        (0, None, [slice(0, 512)]),
        (1, None, [slice(512, 1024), slice(1024, 1280)]),
    ]
    non_opt_slices_gen = [
        (None, 0.5, [slice(1280, 1792)]),
        (None, 2.0, [slice(1792, 2048)]),
    ]
    with_prior_prec = True

    W = build_group_weights(opt_slices_gen, non_opt_slices_gen, G, P,
                            with_prior_prec=with_prior_prec)

    key = jax.random.PRNGKey(0)
    k1, k2 = jax.random.split(key)
    J_row = jax.random.normal(k1, (N_ROW, P), dtype=jnp.float32)
    J_col = jax.random.normal(k2, (N_COL, P), dtype=jnp.float32)

    # Full kernel slice: (G, N_row, N_col)
    out_full = parallel_calc_kernel(J_row, J_col, W, calc_diag=False)
    out_full = jax.block_until_ready(out_full)

    # Diagonal kernel slice: (G, N_row)
    out_diag = parallel_calc_kernel(J_row, J_col, W, calc_diag=True)
    out_diag = jax.block_until_ready(out_diag)

    # Pure-JAX reference for correctness.
    ref_full = jnp.einsum('gj,ij,kj->gik', W, J_row, J_col)
    ref_diag = jnp.einsum('gj,ij,ij->gi', W, J_row, J_col)

    assert out_full.shape == (G, N_ROW, N_COL)
    assert out_diag.shape == (G, N_ROW)
    np.testing.assert_allclose(np.asarray(out_full), np.asarray(ref_full),
                               rtol=1e-3, atol=1e-3)
    np.testing.assert_allclose(np.asarray(out_diag), np.asarray(ref_diag),
                               rtol=1e-3, atol=1e-3)

    print("KERNEL_OK")
</pallas_src>

<mosaic_0001>
module attributes {stable_mosaic.version = 11 : i64} {
  func.func @_full_kernel(%arg0: i32, %arg1: i32, %arg2: memref<3x512xf32, #tpu.memory_space<vmem>>, %arg3: memref<16x512xf32, #tpu.memory_space<vmem>>, %arg4: memref<16x512xf32, #tpu.memory_space<vmem>>, %arg5: memref<48x16xf32, #tpu.memory_space<vmem>>) attributes {dimension_semantics = [#tpu.dimension_semantics<parallel>, #tpu.dimension_semantics<arbitrary>], iteration_bounds = array<i64: 1, 4>, scalar_prefetch = 0 : i64, scratch_operands = 0 : i64, tpu.core_type = #tpu.core_type<tc>, window_params = [{transform_indices = @transform_0, window_bounds = array<i64: 3, 512>}, {transform_indices = @transform_1, window_bounds = array<i64: 16, 512>}, {transform_indices = @transform_2, window_bounds = array<i64: 16, 512>}, {transform_indices = @transform_3, window_bounds = array<i64: 48, 16>}]} {
    %c0_i32 = arith.constant 0 : i32
    %0 = arith.cmpi eq, %arg1, %c0_i32 : i32
    %1 = arith.extui %0 : i1 to i32
    %c0_i32_0 = arith.constant 0 : i32
    %2 = arith.cmpi ne, %1, %c0_i32_0 : i32
    scf.if %2 {
      %cst_10 = arith.constant 0.000000e+00 : f32
      %20 = vector.broadcast %cst_10 : f32 to vector<48x16xf32>
      %c0_11 = arith.constant 0 : index
      %c0_12 = arith.constant 0 : index
      %21 = vector.load %arg5[%c0_11, %c0_12] : memref<48x16xf32, #tpu.memory_space<vmem>>, vector<48x16xf32>
      tpu.vector_store %arg5[%c0_11, %c0_12], %20 {strides = array<i32>} : memref<48x16xf32, #tpu.memory_space<vmem>>, vector<48x16xf32>,
    } else {
    }
    %c0 = arith.constant 0 : index
    %c0_1 = arith.constant 0 : index
    %3 = vector.load %arg2[%c0, %c0_1] : memref<3x512xf32, #tpu.memory_space<vmem>>, vector<3x512xf32>
    %c0_2 = arith.constant 0 : index
    %c0_3 = arith.constant 0 : index
    %4 = vector.load %arg3[%c0_2, %c0_3] : memref<16x512xf32, #tpu.memory_space<vmem>>, vector<16x512xf32>
    %c0_4 = arith.constant 0 : index
    %c0_5 = arith.constant 0 : index
    %5 = vector.load %arg4[%c0_4, %c0_5] : memref<16x512xf32, #tpu.memory_space<vmem>>, vector<16x512xf32>
    %6 = vector.extract_strided_slice %3 {offsets = [0, 0], sizes = [1, 512], strides = [1, 1]} : vector<3x512xf32> to vector<1x512xf32>
    %7 = vector.broadcast %6 : vector<1x512xf32> to vector<16x512xf32>
    %8 = arith.mulf %4, %7 : vector<16x512xf32>
    %9 = vector.extract_strided_slice %3 {offsets = [1, 0], sizes = [1, 512], strides = [1, 1]} : vector<3x512xf32> to vector<1x512xf32>
    %10 = vector.broadcast %9 : vector<1x512xf32> to vector<16x512xf32>
    %11 = arith.mulf %4, %10 : vector<16x512xf32>
    %12 = vector.extract_strided_slice %3 {offsets = [2, 0], sizes = [1, 512], strides = [1, 1]} : vector<3x512xf32> to vector<1x512xf32>
    %13 = vector.broadcast %12 : vector<1x512xf32> to vector<16x512xf32>
    %14 = arith.mulf %4, %13 : vector<16x512xf32>
    %15 = tpu.concatenate %8, %11, %14 in 0 : vector<16x512xf32>, vector<16x512xf32>, vector<16x512xf32> -> vector<48x512xf32>
    %c0_6 = arith.constant 0 : index
    %c0_7 = arith.constant 0 : index
    %16 = vector.load %arg5[%c0_6, %c0_7] : memref<48x16xf32, #tpu.memory_space<vmem>>, vector<48x16xf32>
    %cst = arith.constant dense<0.000000e+00> : vector<48x16xf32>
    %17 = tpu.matmul %15, %5, %cst {dimension_numbers = #tpu.dot_dimension_numbers<[1], [1], [0], [0], [0, 0, 1, 0], [], []>} : vector<48x512xf32>, vector<16x512xf32>, vector<48x16xf32> -> vector<48x16xf32>
    %18 = arith.addf %16, %17 : vector<48x16xf32>
    %c0_8 = arith.constant 0 : index
    %c0_9 = arith.constant 0 : index
    %19 = vector.load %arg5[%c0_8, %c0_9] : memref<48x16xf32, #tpu.memory_space<vmem>>, vector<48x16xf32>
    tpu.vector_store %arg5[%c0_8, %c0_9], %18 {strides = array<i32>} : memref<48x16xf32, #tpu.memory_space<vmem>>, vector<48x16xf32>,
    return
  }
  func.func @transform_0(%arg0: i32, %arg1: i32) -> (i32, i32) {
    %c0_i32 = arith.constant 0 : i32
    %c0_i32_0 = arith.constant 0 : i32
    return %c0_i32, %arg1 : i32, i32
  }
  func.func @transform_1(%arg0: i32, %arg1: i32) -> (i32, i32) {
    %c0_i32 = arith.constant 0 : i32
    %c0_i32_0 = arith.constant 0 : i32
    return %c0_i32, %arg1 : i32, i32
  }
  func.func @transform_2(%arg0: i32, %arg1: i32) -> (i32, i32) {
    %c0_i32 = arith.constant 0 : i32
    return %arg0, %arg1 : i32, i32
  }
  func.func @transform_3(%arg0: i32, %arg1: i32) -> (i32, i32) {
    %c0_i32 = arith.constant 0 : i32
    %c0_i32_0 = arith.constant 0 : i32
    return %c0_i32, %arg0 : i32, i32
  }
}

</mosaic_0001>

<bundles_post_ra>
// kernel: tpu_custom_call.1
= control target key start
LH: loop header
LB: loop body
LE: loop exit
PB: predicated region body
PF: predicated region fallthrough
CT: control target
= control target key end

     0   :  { %s1343_s0 = inlined_call_operand.hbm [shape: f32[3,2048], index: 0, kind: input, shape index: {}]   ;;  %s1344_s1 = inlined_call_operand.hbm [shape: f32[16,2048], index: 1, kind: input, shape index: {}]   ;;  %s1345_s2 = inlined_call_operand.hbm [shape: f32[16,2048], index: 2, kind: input, shape index: {}]   ;;  %s1346_s3 = inlined_call_operand.vmem [shape: f32[48,16], index: 3, kind: output, shape index: {}]  }
   0x1   :  { %1352 = sst [smem:[#allocation9_spill]] %s1344_s1 }
   0x2   :  { %8 = vsyncpa [#allocation3], 0 }
   0x3   :  { %10 = vsyncpa [#allocation3 + $0x1], 0 }
   0x4   :  { %11 = vsyncpa [#allocation5], 0 }
   0x5   :  { %13 = vsyncpa [#allocation5 + $0x1], 0  ;;  %s1046_s12 = smov 0   ;;  %s1048_s13 = smov 0  }
   0x6   :  { %s1050_s14 = smov 0   ;;  %s1052_s15 = smov 0  }
   0x7   :  { %s1054_s16 = smov 0   ;;  %s1056_s17 = smov 0  }
   0x8 LB: > { %s1348_s18 = sadd.s32 4294967295, %s1017_s17   ;;  %s28_s19 = sadd.s32 1, %s1013_s16  ;;  %s1017_s17 = sphi %s1056_s17, %s19_s17   ;;  %s1013_s16 = sphi %s1054_s16, %s1367_s16   ;;  %s1009_s15 = sphi %s1052_s15, %s1366_s15   ;;  %s1005_s14 = sphi %s1050_s14, %s1365_s14   ;;  %s1001_s13 = sphi %s1048_s13, %s1364_s13   ;;  %s997_s12 = sphi %s1046_s12, %s1363_s12  }
   0x9   : > { %p29_p0 = scmp.ge.s32.totalorder %s28_s19, 4  ;;  %s38_s20 = sadd.s32 1, %s1005_s14 }
   0xa   : > { %p45_p1 = scmp.ne.s32.totalorder %s1005_s14, %s1001_s13  ;;  %p46_p2 = scmp.eq.s32.totalorder %s1017_s17, 0 }
   0xb   : > { %s1369_s19 = smov (%p29_p0, %s28_s19), 0  ;;  %p51_p4 = scmp.ne.s32.totalorder %s1001_s13, %s997_s12 }
   0xc   : > { %p47_p3 = por %p46_p2, %p45_p1  ;;  %s35_s21 = ssub.s32 %s1013_s16, %s1369_s19 }
   0xd   : > { %p52_p5 = scmp.eq.s32.totalorder %s1348_s18, 0  ;;  %p36_p6 = scmp.eq.s32.totalorder %s35_s21, 0 }
   0xe   : > { %p820_p8 = scmp.lt.s32.totalorder %s1017_s17, 4  ;;  %s1096_s24 = sand.u32 1, %s1005_s14  }
   0xf   : > { %p1087_p7 = por %p52_p5, %p51_p4  ;;  %s174_s26 = sand.u32 1, %s1017_s17  }
  0x10   : > { %s1093_s23 = scalar_select %p36_p6, %s1005_s14, %s38_s20  }
  0x11   : > { %s1353_s22 = scalar_select %p1087_p7, 1, 0 }
  0x12   : > { %p1098_p9 = pnand %p820_p8, %p47_p3  ;;  %s779_s27 = sshll.u32 %s1096_s24, 6 }
  0x13   : > { %s794_s28 = sshll.u32 %s1013_s16, 9  ;;  %s1355_s1 = sld [smem:[#allocation9_spill]] }
  0x14   : > { %s1354_s25 = scalar_select %p1098_p9, 1, 0 }
  0x15   : > { %s178_s5 = scalar_lea.vmem [#allocation4], %s779_s27  ;;  %s1116_s7 = scalar_lea.sflag [#allocation5], %s174_s26 }
  0x16   : > { %s185_s6 = sshll.u32 %s178_s5, 4  ;;  %p1122_p11 = pneg %p1098_p9  ;;  %s1114_s6 = int_to_ptr.vmem [resolvable:$true] %s185_s6 }
  0x19   : > { %s1110_s4 = scalar_lea.hbm %s1355_s1, %s794_s28  ;;  %s878_s12 = scalar_lea.hbm %s1355_s1, 4096 }
  0x1a   : > { %s873_s8 = scalar_lea.hbm %s1110_s4, 1024  ;;  %p879_p0 = scmp.lt.u32.totalorder %s1110_s4, %s1355_s1 }
  0x1b   : > { %p874_p10 = scmp.ne.s32.totalorder %s1110_s4, %s873_s8  ;;  %p880_p1 = scmp.lt.u32.totalorder %s878_s12, %s873_s8 }
  0x1c   : > { %p882_p3 = scmp.lt.u32.totalorder %s873_s8, %s1110_s4 }
  0x1d   : > { %p876_p12 = pnand %p1122_p11, %p874_p10  ;;  %p881_p2 = por %p880_p1, %p879_p0 }
  0x1f   : > { %p877_p13 = pneg %p876_p12  ;;  %p883_p4 = por %p882_p3, %p881_p2 }
  0x21   : > { %p884_p5 = pnand %p883_p4, %p877_p13 }
  0x23   : > { %887 = shalt.err (!%p884_p5)
}
  0x24   : > { %s888_s26 = scalar_lea.vmem %s1114_s6, 1024  ;;  %s1019_s29 = smov [#allocation4]  }
  0x25   : > { %p889_p6 = scmp.ne.s32.totalorder %s1114_s6, %s888_s26  ;;  %s893_s30 = sshll.u32 %s1019_s29, 4  ;;  %s894_s30 = int_to_ptr.vmem [resolvable:$false] %s893_s30 }
  0x26   : > { %s895_s5 = scalar_lea.vmem %s894_s30, 2048  ;;  %p896_p12 = scmp.lt.s32.totalorder %s1114_s6, %s894_s30 }
  0x27   : > { %p891_p8 = pnand %p889_p6, %p1122_p11  ;;  %p897_p7 = scmp.lt.s32.totalorder %s895_s5, %s888_s26 }
  0x29   : > { %p892_p10 = pneg %p891_p8  ;;  %p898_p0 = por %p897_p7, %p896_p12 }
  0x2b   : > { %p899_p1 = pnand %p898_p0, %p892_p10 }
  0x2d   : > { %902 = shalt.err (!%p899_p1)
}
  0x2e   : > { %s1349_s8 = smov 2048   ;;  %s1021_s10 = smov 512  }
  0x2f   : > { %s1022_s11 = smov 32   ;;  %s1154_s21 = scalar_lea.hbm %s1345_s2, %s794_s28 }
  0x30   : > { %816 = dma.hbm_to_vmem [thread:$0]  (!%p1098_p9), %s1110_s4, 1024, %s1114_s6, %s1116_s7, %s1349_s8, %s1021_s10, %s1022_s11  }
  0x31   : > { %p785_p7 = scmp.ge.s32.totalorder %s1017_s17, 1  ;;  %s199_s26 = scalar_lea.vmem [#allocation6], %s779_s27 }
  0x32   : > { %s209_s29 = sshll.u32 %s199_s26, 4  ;;  %p217_p13 = scmp.lt.s32.totalorder %s1017_s17, 5  ;;  %s1171_s29 = int_to_ptr.vmem [resolvable:$true] %s209_s29 }
  0x33   : > { %s776_s5 = sshll.u32 %s1096_s24, 4  ;;  %s793_s18 = sshll.u32 %s1013_s16, 8 }
  0x34   : > { %p1160_p2 = pnand %p785_p7, %p217_p13  ;;  %s1169_s6 = scalar_lea.hbm %s1343_s0, %s793_s18 }
  0x35   : > { %s159_s27 = scalar_lea.vmem [#allocation2], %s776_s5  ;;  %s156_s12 = scalar_lea.sflag [#allocation3], %s1096_s24 }
  0x36   : > { %s1357_s30 = scalar_select %p1160_p2, 1, 0 }
  0x37   : > { %s167_s28 = sshll.u32 %s159_s27, 4  ;;  %s903_s20 = scalar_lea.hbm %s1169_s6, 256  ;;  %s168_s28 = int_to_ptr.vmem [resolvable:$true] %s167_s28 }
  0x38   : > { %p904_p3 = scmp.ne.s32.totalorder %s1169_s6, %s903_s20  ;;  %s908_s1 = scalar_lea.hbm %s1343_s0, 1024 }
  0x39   : > { %p909_p6 = scmp.lt.u32.totalorder %s1169_s6, %s1343_s0  ;;  %p910_p8 = scmp.lt.u32.totalorder %s908_s1, %s903_s20 }
  0x3a   : > { %p906_p4 = pnand %p904_p3, %p1122_p11  ;;  %p912_p12 = scmp.lt.u32.totalorder %s903_s20, %s1169_s6 }
  0x3b   : > { %p911_p10 = por %p910_p8, %p909_p6 }
  0x3c   : > { %p907_p5 = pneg %p906_p4 }
  0x3d   : > { %p913_p0 = por %p912_p12, %p911_p10 }
  0x3f   : > { %p914_p1 = pnand %p913_p0, %p907_p5 }
  0x41   : > { %917 = shalt.err (!%p914_p1)
}
  0x42   : > { %s918_s24 = scalar_lea.vmem %s168_s28, 256  ;;  %s1023_s5 = smov [#allocation2]  }
  0x43   : > { %p919_p7 = scmp.ne.s32.totalorder %s168_s28, %s918_s24  ;;  %s923_s27 = sshll.u32 %s1023_s5, 4  ;;  %s924_s27 = int_to_ptr.vmem [resolvable:$false] %s923_s27 }
  0x44   : > { %s925_s8 = scalar_lea.vmem %s924_s27, 512  ;;  %p926_p4 = scmp.lt.s32.totalorder %s168_s28, %s924_s27 }
  0x45   : > { %p921_p13 = pnand %p919_p7, %p1122_p11  ;;  %p927_p2 = scmp.lt.s32.totalorder %s925_s8, %s918_s24 }
  0x47   : > { %p922_p3 = pneg %p921_p13  ;;  %p928_p9 = por %p927_p2, %p926_p4 }
  0x49   : > { %p929_p6 = pnand %p928_p9, %p922_p3 }
  0x4b   : > { %932 = shalt.err (!%p929_p6)
}
  0x4c   : > { %p1358_p8 = scmp.ne.s32.totalorder %s1354_s25, 0  ;;  %s933_s20 = scalar_lea.hbm %s1154_s21, 1024 }
  0x4d   : > { %p934_p5 = scmp.ne.s32.totalorder %s1154_s21, %s933_s20  ;;  %s938_s18 = scalar_lea.hbm %s1345_s2, 4096 }
  0x4e   : > { %813 = dma.hbm_to_vmem [thread:$0]  (!%p1358_p8), %s1169_s6, 256, %s168_s28, %s156_s12  }
  0x4f   : > { %p936_p10 = pnand %p934_p5, %p1122_p11  ;;  %p939_p9 = scmp.lt.u32.totalorder %s1154_s21, %s1345_s2 }
  0x50   : > { %p940_p2 = scmp.lt.u32.totalorder %s938_s18, %s933_s20  ;;  %p942_p1 = scmp.lt.u32.totalorder %s933_s20, %s1154_s21 }
  0x51   : > { %p937_p12 = pneg %p936_p10 }
  0x52   : > { %p941_p0 = por %p940_p2, %p939_p9 }
  0x54   : > { %p943_p7 = por %p942_p1, %p941_p0 }
  0x56   : > { %p944_p13 = pnand %p943_p7, %p937_p12 }
  0x58   : > { %947 = shalt.err (!%p944_p13)
}
  0x59   : > { %s948_s6 = scalar_lea.vmem %s1171_s29, 1024  ;;  %s1024_s28 = smov [#allocation6]  }
  0x5a   : > { %p949_p3 = scmp.ne.s32.totalorder %s1171_s29, %s948_s6  ;;  %s953_s12 = sshll.u32 %s1024_s28, 4  ;;  %s954_s12 = int_to_ptr.vmem [resolvable:$false] %s953_s12 }
  0x5b   : > { %s955_s5 = scalar_lea.vmem %s954_s12, 2048  ;;  %p956_p5 = scmp.lt.s32.totalorder %s1171_s29, %s954_s12 }
  0x5c   : > { %p951_p4 = pnand %p949_p3, %p1122_p11  ;;  %p957_p10 = scmp.lt.s32.totalorder %s955_s5, %s948_s6 }
  0x5e   : > { %p952_p6 = pneg %p951_p4  ;;  %p958_p9 = por %p957_p10, %p956_p5 }
  0x60   : > { %p959_p2 = pnand %p958_p9, %p952_p6 }
  0x62   : > { %962 = shalt.err (!%p959_p2)
}
  0x63   : > { %s1359_s27 = smov 2048   ;;  %p1360_p11 = scmp.ne.s32.totalorder %s1357_s30, 0 }
  0x64   : > { %819 = dma.hbm_to_vmem [thread:$0]  (!%p1358_p8), %s1154_s21, 1024, %s1171_s29, %s1116_s7, %s1359_s27, %s1021_s10, %s1022_s11  }
  0x65   : > { %221 = sbr.rel (%p1360_p11) target bundleno = 372 (0x174), region = 32  ;;  %s223_s9 = sand.u32 (!%p1360_p11), 1, %s1001_s13  }
  0x66   : > { %s786_s8 = sshll.u32 (!%p1360_p11), %s223_s9, 4  ;;  %s224_s20 = scalar_lea.sflag (!%p1360_p11), [#allocation3], %s223_s9 }
  0x67   : > { %s1219_s26 = scalar_lea.vmem (!%p1360_p11), [#allocation2], %s786_s8  ;;  %p1361_p12 = scmp.ne.s32.totalorder (!%p1360_p11), %s1353_s22, 0 }
  0x6c   : > { %988 = dma.done.wait (%p1361_p12), %s224_s20, 256  }
  0x6d   : > { %990 = vsyncadd (%p1361_p12), %s224_s20, 4294967040  ;;  %s1362_s25 = sadd.s32 4294967295, %s1017_s17   ;;  %s787_s7 = sshll.u32 %s223_s9, 6 }
  0x6e   : > { %s232_s1 = sand.u32 1, %s1362_s25   ;;  %s1227_s11 = scalar_lea.vmem [#allocation4], %s787_s7 }
  0x6f   : > { %s233_s10 = scalar_lea.sflag [#allocation5], %s232_s1 }
  0x70   : > { %992 = dma.done.wait (%p1361_p12), %s233_s10, 2048  }
  0x71   : > { %994 = vsyncadd (%p1361_p12), %s233_s10, 4294965248  ;;  %s245_s21 = scalar_lea.vmem [#allocation6], %s787_s7  ;;  %p789_p8 = scmp.ne.s32.totalorder %s1009_s15, 0 }
  0x72   : > { %vm289_vm0 = vcmask (!%p789_p8), 130048   ;;  %v1025_v0 = vmov (!%p789_p8), 0.0  }
  0x73   : > { %288 = sbr.rel (%p789_p8) target bundleno = 122 (0x7a), region = 48  ;;  %290 = vst.msk [vmem:[%s1346_s3] sm:$0xff] (!%p789_p8), %vm289_vm0, %v1025_v0  ;;  %291 = vst.msk [vmem:[%s1346_s3 + $0x8] sm:$0xff] (!%p789_p8), %vm289_vm0, %v1025_v0 }
  0x74   : > { %292 = vst.msk [vmem:[%s1346_s3 + $0x10] sm:$0xff] (!%p789_p8), %vm289_vm0, %v1025_v0  ;;  %293 = vst.msk [vmem:[%s1346_s3 + $0x18] sm:$0xff] (!%p789_p8), %vm289_vm0, %v1025_v0 }
  0x75   : > { %294 = vst.msk [vmem:[%s1346_s3 + $0x20] sm:$0xff] (!%p789_p8), %vm289_vm0, %v1025_v0  ;;  %295 = vst.msk [vmem:[%s1346_s3 + $0x28] sm:$0xff] (!%p789_p8), %vm289_vm0, %v1025_v0 }
  0x7a PF: > { %v307_v1 = vld [vmem:[%s245_s21 + $0x8] sm:$0xff]  ;;  %v309_v3 = vld [vmem:[%s245_s21 + $0x18] sm:$0xff]  ;;  %v316_v4 = vlaneseq  ;;  %v306_v7 = vld [vmem:[%s245_s21] sm:$0xff]  ;;  %vm650_vm1 = vcmask 130048  }
  0x7b   : > { %v311_v2 = vld [vmem:[%s245_s21 + $0x28] sm:$0xff]  ;;  %v313_v6 = vld [vmem:[%s245_s21 + $0x38] sm:$0xff]  ;;  %v310_v8 = vld [vmem:[%s245_s21 + $0x20] sm:$0xff] }
  0x7c   : > { %v796_v5 = vpack.c.bf16 %v311_v2, %v307_v1  ;;  %v800_v9 = vpack.c.bf16 %v313_v6, %v309_v3  ;;  %v798_v10 = vpack.c.bf16 %v310_v8, %v306_v7  ;;  %v308_v11 = vld [vmem:[%s245_s21 + $0x10] sm:$0xff]  ;;  %v317_v13 = vshrl.u32 %v316_v4, 7  ;;  %v1256_v16 = vld [vmem:[%s1219_s26 + $0x8] sm:$0x77]  ;;  %v298_v27 = vld [vmem:[%s1227_s11] sm:$0xff] }
  0x7d   : > { %v312_v12 = vld [vmem:[%s245_s21 + $0x30] sm:$0xff]  ;;  %v1259_v21 = vld [vmem:[%s1227_s11 + $0x8] sm:$0xff]  ;;  %v301_v26 = vld [vmem:[%s1227_s11 + $0x18] sm:$0xff] }
  0x7e   : > { %797 = vmatprep.subr.bf16.mxu0 %v796_v5  ;;  %v802_v14 = vpack.c.bf16 %v312_v12, %v308_v11  ;;  %v1253_v15 = vld [vmem:[%s1219_s26] sm:$0x77]  ;;  %801 = vmatprep.subr.bf16.mxu1 %v800_v9  ;;  %v318_v17 = vsub.s32 0, %v317_v13  ;;  %v322_v18 = vsub.s32 4, %v317_v13  ;;  %v362_v19 = vsub.s32 1, %v317_v13  ;;  %v303_v37 = vld [vmem:[%s1227_s11 + $0x28] sm:$0xff] }
  0x7f   : > { %799 = vmatpush1.bf16.xpose.msra.mxu0 %v798_v10  ;;  %v366_v20 = vsub.s32 5, %v317_v13  ;;  %v300_v28 = vld [vmem:[%s1227_s11 + $0x10] sm:$0xff]  ;;  %v305_v38 = vld [vmem:[%s1227_s11 + $0x38] sm:$0xff]  ;;  %v410_v41 = vsub.s32 6, %v317_v13  ;;  %v302_v46 = vld [vmem:[%s1227_s11 + $0x20] sm:$0xff]  ;;  %v406_v54 = vsub.s32 2, %v317_v13 }
  0x80   : > { %803 = vmatpush1.bf16.xpose.msra.mxu1 %v802_v14  ;;  %v323_v22 = vrot.slane %v1253_v15, %v322_v18  ;;  %v331_v23 = vrot.slane %v1256_v16, %v322_v18  ;;  %v319_v24 = vrot.slane %v1253_v15, %v318_v17  ;;  %v327_v25 = vrot.slane %v1256_v16, %v318_v17  ;;  %v304_v47 = vld [vmem:[%s1227_s11 + $0x30] sm:$0xff] }
  0x81   : > { %v367_v29 = vrot.slane %v1253_v15, %v366_v20  ;;  %v375_v30 = vrot.slane %v1256_v16, %v366_v20  ;;  %v363_v31 = vrot.slane %v1253_v15, %v362_v19  ;;  %v371_v32 = vrot.slane %v1256_v16, %v362_v19 }
  0x82   : > { %v343_v33 = vrot.slane %v323_v22, %v318_v17  ;;  %v351_v34 = vrot.slane %v331_v23, %v318_v17  ;;  %v339_v35 = vrot.slane %v319_v24, %v318_v17  ;;  %v347_v36 = vrot.slane %v327_v25, %v318_v17  ;;  %v449_v23 = vld [vmem:[%s1346_s3 + $0x8] sm:$0xff] }
  0x83   : > { %v387_v39 = vrot.slane %v367_v29, %v362_v19  ;;  %v395_v40 = vrot.slane %v375_v30, %v362_v19  ;;  %v383_v50 = vrot.slane %v363_v31, %v362_v19  ;;  %v391_v51 = vrot.slane %v371_v32, %v362_v19  ;;  %v450_v30 = vld [vmem:[%s1346_s3 + $0x10] sm:$0xff] }
  0x84   : > { %v353_v42 = vmul.f32 %v343_v33, %v1259_v21  ;;  %v355_v43 = vmul.f32 %v351_v34, %v301_v26  ;;  %v352_v44 = vmul.f32 %v339_v35, %v298_v27  ;;  %v354_v45 = vmul.f32 %v347_v36, %v300_v28 }
  0x85   : > { %v357_v48 = vmul.f32 %v343_v33, %v303_v37  ;;  %v359_v49 = vmul.f32 %v351_v34, %v305_v38  ;;  %v356_v52 = vmul.f32 %v339_v35, %v302_v46  ;;  %v358_v53 = vmul.f32 %v347_v36, %v304_v47 }
  0x86   : > { %518 = vmatprep.mubr.f32.mxu0 %v353_v42  ;;  %613 = vmatprep.mubr.f32.mxu1 %v355_v43  ;;  %v397_v55 = vmul.f32 %v387_v39, %v1259_v21  ;;  %v399_v56 = vmul.f32 %v395_v40, %v301_v26  ;;  %v411_v57 = vrot.slane %v1253_v15, %v410_v41 }
  0x87   : > { %519 = vmatmul.mubr.f32.vlgmr.msra.gmra.mrb[0].mxu0 %v352_v44  ;;  %614 = vmatmul.mubr.f32.vlgmr.msra.gmra.mrb[0].mxu1 %v354_v45  ;;  %v419_v58 = vrot.slane %v1256_v16, %v410_v41  ;;  %v396_v59 = vmul.f32 %v383_v50, %v298_v27  ;;  %v398_v60 = vmul.f32 %v391_v51, %v300_v28  ;;  %v452_v44 = vld [vmem:[%s1346_s3 + $0x20] sm:$0xff] }
  0x88   : > { %523 = vmatprep.mubr.f32.mxu0 %v357_v48  ;;  %618 = vmatprep.mubr.f32.mxu1 %v359_v49  ;;  %v401_v61 = vmul.f32 %v387_v39, %v303_v37  ;;  %v407_v62 = vrot.slane %v1253_v15, %v406_v54  ;;  %v415_v63 = vrot.slane %v1256_v16, %v406_v54  ;;  %v448_v16 = vld [vmem:[%s1346_s3] sm:$0xff] }
  0x89   : > { %v403_v0 = vmul.f32 %v395_v40, %v305_v38  ;;  %v431_v1 = vrot.slane %v411_v57, %v406_v54  ;;  %v439_v2 = vrot.slane %v419_v58, %v406_v54  ;;  %v400_v3 = vmul.f32 %v383_v50, %v302_v46 }
  0x8a   : > { %v402_v4 = vmul.f32 %v391_v51, %v304_v47  ;;  %v427_v5 = vrot.slane %v407_v62, %v406_v54  ;;  %v435_v6 = vrot.slane %v415_v63, %v406_v54  ;;  %v453_v51 = vld [vmem:[%s1346_s3 + $0x28] sm:$0xff] }
  0x8b   : > { %524 = vmatmul.mubr.f32.gmra.mrb[2].mxu0 %v356_v52  ;;  %619 = vmatmul.mubr.f32.gmra.mrb[2].mxu1 %v358_v53  ;;  %v441_v7 = vmul.f32 %v431_v1, %v1259_v21  ;;  %v443_v8 = vmul.f32 %v439_v2, %v301_v26  ;;  %v445_v11 = vmul.f32 %v431_v1, %v303_v37  ;;  %v451_v37 = vld [vmem:[%s1346_s3 + $0x18] sm:$0xff] }
  0x8c   : > { %528 = vmatprep.mubr.f32.mxu0 %v397_v55  ;;  %623 = vmatprep.mubr.f32.mxu1 %v399_v56  ;;  %v440_v9 = vmul.f32 %v427_v5, %v298_v27  ;;  %v442_v10 = vmul.f32 %v435_v6, %v300_v28  ;;  %v447_v12 = vmul.f32 %v439_v2, %v305_v38 }
  0x8d   : > { %v444_v13 = vmul.f32 %v427_v5, %v302_v46  ;;  %v446_v14 = vmul.f32 %v435_v6, %v304_v47 }
  0x8f   : > { %529 = vmatmul.mubr.f32.gmra.mrb[4].mxu0 %v396_v59  ;;  %624 = vmatmul.mubr.f32.gmra.mrb[4].mxu1 %v398_v60 }
  0x90   : > { %533 = vmatprep.mubr.f32.mxu0 %v401_v61  ;;  %628 = vmatprep.mubr.f32.mxu1 %v403_v0 }
  0x93   : > { %534 = vmatmul.mubr.f32.gmra.mrb[6].mxu0 %v400_v3  ;;  %629 = vmatmul.mubr.f32.gmra.mrb[6].mxu1 %v402_v4 }
  0x94   : > { %538 = vmatprep.mubr.f32.mxu0 %v441_v7  ;;  %633 = vmatprep.mubr.f32.mxu1 %v443_v8 }
  0x97   : > { %539 = vmatmul.mubr.f32.gmra.mrb[8].mxu0 %v440_v9  ;;  %634 = vmatmul.mubr.f32.gmra.mrb[8].mxu1 %v442_v10 }
  0x98   : > { %543 = vmatprep.mubr.f32.mxu0 %v445_v11  ;;  %638 = vmatprep.mubr.f32.mxu1 %v447_v12 }
  0x9b   : > { %544 = vmatmul.mubr.f32.gmra.mrb[10].mxu0 %v444_v13  ;;  %639 = vmatmul.mubr.f32.gmra.mrb[10].mxu1 %v446_v14 }
 0x15a   : > { %v520_v15 = vpop.f32.mrb[0].mxu0  ;;  %v615_v17 = vpop.f32.mrb[0].mxu1 }
 0x15b   : > { %v616_v18 = vadd.f32 %v615_v17, %v520_v15  ;;  %v522_v19 = vpop.f32.mrb[1].mxu0  ;;  %v617_v20 = vpop.f32.mrb[1].mxu1 }
 0x15d   : > { %v644_v21 = vadd.f32 %v616_v18, %v448_v16 }
 0x15e   : > { %v525_v22 = vpop.f32.mrb[2].mxu0  ;;  %v620_v24 = vpop.f32.mrb[2].mxu1 }
 0x15f   : > { %651 = vst.msk [vmem:[%s1346_s3] sm:$0xff] %vm650_vm1, %v644_v21  ;;  %v621_v25 = vadd.f32 %v620_v24, %v525_v22  ;;  %v527_v26 = vpop.f32.mrb[3].mxu0  ;;  %v622_v27 = vpop.f32.mrb[3].mxu1 }
 0x161   : > { %v645_v28 = vadd.f32 %v621_v25, %v449_v23 }
 0x162   : > { %v530_v29 = vpop.f32.mrb[4].mxu0  ;;  %v625_v31 = vpop.f32.mrb[4].mxu1 }
 0x163   : > { %652 = vst.msk [vmem:[%s1346_s3 + $0x8] sm:$0xff] %vm650_vm1, %v645_v28  ;;  %v626_v32 = vadd.f32 %v625_v31, %v530_v29  ;;  %v532_v33 = vpop.f32.mrb[5].mxu0  ;;  %v627_v34 = vpop.f32.mrb[5].mxu1 }
 0x165   : > { %v646_v35 = vadd.f32 %v626_v32, %v450_v30 }
 0x166   : > { %v535_v36 = vpop.f32.mrb[6].mxu0  ;;  %v630_v38 = vpop.f32.mrb[6].mxu1 }
 0x167   : > { %653 = vst.msk [vmem:[%s1346_s3 + $0x10] sm:$0xff] %vm650_vm1, %v646_v35  ;;  %v631_v39 = vadd.f32 %v630_v38, %v535_v36  ;;  %v537_v40 = vpop.f32.mrb[7].mxu0  ;;  %v632_v41 = vpop.f32.mrb[7].mxu1 }
 0x169   : > { %v647_v42 = vadd.f32 %v631_v39, %v451_v37 }
 0x16a   : > { %v540_v43 = vpop.f32.mrb[8].mxu0  ;;  %v635_v45 = vpop.f32.mrb[8].mxu1 }
 0x16b   : > { %654 = vst.msk [vmem:[%s1346_s3 + $0x18] sm:$0xff] %vm650_vm1, %v647_v42  ;;  %v636_v46 = vadd.f32 %v635_v45, %v540_v43  ;;  %v542_v47 = vpop.f32.mrb[9].mxu0  ;;  %v637_v48 = vpop.f32.mrb[9].mxu1 }
 0x16d   : > { %v648_v49 = vadd.f32 %v636_v46, %v452_v44 }
 0x16e   : > { %v545_v50 = vpop.f32.mrb[10].mxu0  ;;  %v640_v52 = vpop.f32.mrb[10].mxu1 }
 0x16f   : > { %655 = vst.msk [vmem:[%s1346_s3 + $0x20] sm:$0xff] %vm650_vm1, %v648_v49  ;;  %v641_v53 = vadd.f32 %v640_v52, %v545_v50  ;;  %v547_v54 = vpop.f32.mrb[11].mxu0  ;;  %v642_v55 = vpop.f32.mrb[11].mxu1 }
 0x171   : > { %v649_v56 = vadd.f32 %v641_v53, %v453_v51 }
 0x173   : > { %656 = vst.msk [vmem:[%s1346_s3 + $0x28] sm:$0xff] %vm650_vm1, %v649_v56 }
 0x174 PF: > { %s19_s17 = sadd.s32 1, %s1017_s17   ;;  %s1363_s12 = smov %s1001_s13 }
 0x175   : > { %p16_p0 = scmp.ge.s32.totalorder %s19_s17, 6   ;;  %s1364_s13 = smov %s1005_s14 }
 0x176   : > { %s1365_s14 = smov %s1093_s23  ;;  %s1366_s15 = smov %s1013_s16 }
 0x177   : > { %s1367_s16 = smov %s1369_s19  ;;  %18 = sbr.rel (!%p16_p0) target bundleno = 8 (0x8), region = 100 }
 0x17e   :  { %676 = vsyncpa [#allocation3], 1 }
 0x17f   :  { %678 = vsyncpa [#allocation3 + $0x1], 1 }
 0x180   :  { %679 = vsyncpa [#allocation5], 1 }
 0x181   :  { %681 = vsyncpa [#allocation5 + $0x1], 1 }

</bundles_post_ra>
